<compile_context>
chip_gen: v7x
topology: tpu7x:2x2x1
jax: 0.10.0
libtpu: 0.0.40
codegen_flags: <defaults>
</compile_context>

<pallas_src>
import functools

import jax
import jax.numpy as jnp
from jax.experimental import pallas as pl
from jax.experimental.pallas import tpu as pltpu


_INV_T = 0.5                               # 1 / T with T = 2 in the PyTorch module
_VMEM_BUDGET_BYTES = 32 * 1024 * 1024      # accounted per-step footprint target
_VMEM_LIMIT_BYTES = 48 * 1024 * 1024       # leaves headroom under v7x's 64 MiB


def _softmax_last(x):
    m = jnp.max(x, axis=-1, keepdims=True)
    e = jnp.exp(x - m)
    s = jnp.sum(e, axis=-1, keepdims=True)
    # exact reciprocal (approx=True would loosen the tolerance check)
    return e * pl.reciprocal(s, approx=False)


def _jskl_kernel(ys_ref, yt_ref, out_ref, *, batch, block_rows):
    i = pl.program_id(0)

    ys = ys_ref[...].astype(jnp.float32) * _INV_T
    yt = yt_ref[...].astype(jnp.float32) * _INV_T

    p_s = _softmax_last(ys)
    p_t = _softmax_last(yt)

    m = 0.5 * (p_s + p_t)
    # fused KL pair: kl_s + kl_t == 2 * sum(m * (log(m) - m))
    # xlogy-style guard: m == 0 contributes exactly 0 (matches F.kl_div, no NaN)
    term = jnp.where(m > 0.0, m * (jnp.log(m) - m), 0.0)

    def _write(partial):
        out_ref[...] = jnp.full(out_ref.shape, partial, dtype=jnp.float32)

    if batch % block_rows != 0:
        # Only the last tile is partial — gate the masking so full tiles skip it.
        n = pl.num_programs(0)
        is_last = i == n - 1

        @pl.when(is_last)
        def _():
            row = jax.lax.broadcasted_iota(jnp.int32, term.shape, 0) + i * block_rows
            _write(jnp.sum(jnp.where(row < batch, term, 0.0)))

        @pl.when(jnp.logical_not(is_last))
        def _():
            _write(jnp.sum(term))
    else:
        _write(jnp.sum(term))


def _choose_block_rows(batch, classes, in_itemsize):
    """Batch-tile rows sized against the f32-upcast VMEM footprint.

    Per-step accounting:
      inputs:        2 arrays x 2 pipeline buffers x TB*C*in_itemsize
      intermediates: ~4 x TB*C*4  (f32 upcasts / exp / p_s,p_t / m,term)
    Row alignment follows sublane packing: 8 (f32), 16 (bf16), 32 (int8/fp8).
    """
    align = 8 * max(1, 4 // max(1, in_itemsize))
    if batch <= align:
        return batch
    per_row = classes * (4 * in_itemsize + 4 * 4)
    rows = _VMEM_BUDGET_BYTES // max(1, per_row)
    if rows >= batch:
        return batch
    rows = max(align, (rows // align) * align)
    return rows


def jskl_loss(y_s, y_t):
    """Pallas implementation of JSKL.forward(y_s, y_t, mode='classification')."""
    assert y_s.shape == y_t.shape and y_s.ndim == 2
    batch, classes = y_s.shape
    itemsize = jnp.dtype(y_s.dtype).itemsize
    tb = _choose_block_rows(batch, classes, itemsize)
    num_tiles = pl.cdiv(batch, tb)

    kernel = functools.partial(_jskl_kernel, batch=batch, block_rows=tb)

    partials = pl.pallas_call(
        kernel,
        out_shape=jax.ShapeDtypeStruct((num_tiles, 8, 128), jnp.float32),
        grid=(num_tiles,),
        in_specs=[
            pl.BlockSpec((tb, classes), lambda i: (i, 0)),
            pl.BlockSpec((tb, classes), lambda i: (i, 0)),
        ],
        out_specs=pl.BlockSpec((1, 8, 128), lambda i: (i, 0, 0)),
        compiler_params=pltpu.CompilerParams(
            dimension_semantics=("parallel",),
            vmem_limit_bytes=_VMEM_LIMIT_BYTES,
        ),
        cost_estimate=pl.CostEstimate(
            flops=12 * batch * classes,
            transcendentals=3 * batch * classes,
            bytes_accessed=2 * batch * classes * itemsize + num_tiles * 8 * 128 * 4,
        ),
    )(y_s, y_t)

    # 0.1 * 0.5 * js, js = 0.5*(kl_s + kl_t) = sum(m*(log m - m)) / batch
    return (0.05 / batch) * jnp.sum(partials[:, 0, 0])


def _jskl_ref(y_s, y_t):
    # Pure-JAX reference following the original (unfused) PyTorch formula.
    T = 2.0
    p_s = jax.nn.softmax(y_s.astype(jnp.float32) / T, axis=-1)
    p_t = jax.nn.softmax(y_t.astype(jnp.float32) / T, axis=-1)
    m = 0.5 * (p_s + p_t)
    safe_m = jnp.where(m > 0.0, m, 1.0)
    log_m = jnp.log(safe_m)
    batch = y_s.shape[0]
    kl_s = jnp.sum(jnp.where(m > 0.0, m * (log_m - p_s), 0.0)) / batch
    kl_t = jnp.sum(jnp.where(m > 0.0, m * (log_m - p_t), 0.0)) / batch
    return 0.1 * 0.5 * 0.5 * (kl_s + kl_t)


if __name__ == "__main__":
    key = jax.random.PRNGKey(0)
    k1, k2 = jax.random.split(key)
    B, C = 8, 32  # batch of logits, num classes
    y_s = jax.random.normal(k1, (B, C), dtype=jnp.float32)
    y_t = jax.random.normal(k2, (B, C), dtype=jnp.float32)

    out = jax.block_until_ready(jskl_loss(y_s, y_t))
    ref = jax.block_until_ready(_jskl_ref(y_s, y_t))

    if not jnp.allclose(out, ref, rtol=1e-5, atol=1e-5):
        raise AssertionError(f"mismatch: pallas={out} ref={ref}")
    print("KERNEL_OK")
</pallas_src>

<mosaic_0001>
module attributes {stable_mosaic.version = 11 : i64} {
  func.func @_jskl_kernel(%arg0: i32, %arg1: memref<8x32xf32, #tpu.memory_space<vmem>>, %arg2: memref<8x32xf32, #tpu.memory_space<vmem>>, %arg3: memref<1x8x128xf32, #tpu.memory_space<vmem>>) attributes {dimension_semantics = [#tpu.dimension_semantics<parallel>], iteration_bounds = array<i64: 1>, scalar_prefetch = 0 : i64, scratch_operands = 0 : i64, tpu.core_type = #tpu.core_type<tc>, window_params = [{transform_indices = @transform_0, window_bounds = array<i64: 8, 32>}, {transform_indices = @transform_1, window_bounds = array<i64: 8, 32>}, {transform_indices = @transform_2, window_bounds = array<i64: 1, 8, 128>}]} {
    %c0 = arith.constant 0 : index
    %c0_0 = arith.constant 0 : index
    %0 = vector.load %arg1[%c0, %c0_0] : memref<8x32xf32, #tpu.memory_space<vmem>>, vector<8x32xf32>
    %cst = arith.constant 5.000000e-01 : f32
    %1 = vector.broadcast %cst : f32 to vector<8x32xf32>
    %2 = arith.mulf %0, %1 : vector<8x32xf32>
    %c0_1 = arith.constant 0 : index
    %c0_2 = arith.constant 0 : index
    %3 = vector.load %arg2[%c0_1, %c0_2] : memref<8x32xf32, #tpu.memory_space<vmem>>, vector<8x32xf32>
    %cst_3 = arith.constant 5.000000e-01 : f32
    %4 = vector.broadcast %cst_3 : f32 to vector<8x32xf32>
    %5 = arith.mulf %3, %4 : vector<8x32xf32>
    %cst_4 = arith.constant dense<0xFF800000> : vector<8xf32>
    %6 = vector.multi_reduction <maximumf>, %2, %cst_4 [1] : vector<8x32xf32> to vector<8xf32>
    %7 = vector.shape_cast %6 : vector<8xf32> to vector<8x1xf32>
    %8 = vector.broadcast %7 : vector<8x1xf32> to vector<8x32xf32>
    %9 = arith.subf %2, %8 : vector<8x32xf32>
    %10 = math.exp %9 : vector<8x32xf32>
    %cst_5 = arith.constant dense<0.000000e+00> : vector<8xf32>
    %11 = vector.multi_reduction <add>, %10, %cst_5 [1] : vector<8x32xf32> to vector<8xf32>
    %12 = vector.shape_cast %11 : vector<8xf32> to vector<8x1xf32>
    %13 = tpu.reciprocal %12 : vector<8x1xf32> -> vector<8x1xf32>
    %14 = vector.broadcast %13 : vector<8x1xf32> to vector<8x32xf32>
    %15 = arith.mulf %10, %14 : vector<8x32xf32>
    %cst_6 = arith.constant dense<0xFF800000> : vector<8xf32>
    %16 = vector.multi_reduction <maximumf>, %5, %cst_6 [1] : vector<8x32xf32> to vector<8xf32>
    %17 = vector.shape_cast %16 : vector<8xf32> to vector<8x1xf32>
    %18 = vector.broadcast %17 : vector<8x1xf32> to vector<8x32xf32>
    %19 = arith.subf %5, %18 : vector<8x32xf32>
    %20 = math.exp %19 : vector<8x32xf32>
    %cst_7 = arith.constant dense<0.000000e+00> : vector<8xf32>
    %21 = vector.multi_reduction <add>, %20, %cst_7 [1] : vector<8x32xf32> to vector<8xf32>
    %22 = vector.shape_cast %21 : vector<8xf32> to vector<8x1xf32>
    %23 = tpu.reciprocal %22 : vector<8x1xf32> -> vector<8x1xf32>
    %24 = vector.broadcast %23 : vector<8x1xf32> to vector<8x32xf32>
    %25 = arith.mulf %20, %24 : vector<8x32xf32>
    %26 = arith.addf %15, %25 : vector<8x32xf32>
    %cst_8 = arith.constant 5.000000e-01 : f32
    %27 = vector.broadcast %cst_8 : f32 to vector<8x32xf32>
    %28 = arith.mulf %27, %26 : vector<8x32xf32>
    %cst_9 = arith.constant 0.000000e+00 : f32
    %29 = vector.broadcast %cst_9 : f32 to vector<8x32xf32>
    %30 = arith.cmpf ogt, %28, %29 : vector<8x32xf32>
    %31 = math.log %28 : vector<8x32xf32>
    %32 = arith.subf %31, %28 : vector<8x32xf32>
    %33 = arith.mulf %28, %32 : vector<8x32xf32>
    %cst_10 = arith.constant 0.000000e+00 : f32
    %34 = vector.broadcast %cst_10 : f32 to vector<8x32xf32>
    %35 = arith.select %30, %33, %34 : vector<8x32xi1>, vector<8x32xf32>
    %36 = vector.shape_cast %35 : vector<8x32xf32> to vector<1x8x32xf32>
    %cst_11 = arith.constant dense<0.000000e+00> : vector<1xf32>
    %37 = vector.multi_reduction <add>, %36, %cst_11 [1, 2] : vector<1x8x32xf32> to vector<1xf32>
    %38 = vector.shape_cast %37 : vector<1xf32> to vector<1x1x1xf32>
    %39 = vector.extract %38[0, 0, 0] : f32 from vector<1x1x1xf32>
    %40 = vector.broadcast %39 : f32 to vector<1x8x128xf32>
    %c0_12 = arith.constant 0 : index
    %c0_13 = arith.constant 0 : index
    %c0_14 = arith.constant 0 : index
    %41 = vector.load %arg3[%c0_12, %c0_13, %c0_14] : memref<1x8x128xf32, #tpu.memory_space<vmem>>, vector<1x8x128xf32>
    tpu.vector_store %arg3[%c0_12, %c0_13, %c0_14], %40 {strides = array<i32>} : memref<1x8x128xf32, #tpu.memory_space<vmem>>, vector<1x8x128xf32>,
    return
  }
  func.func @transform_0(%arg0: i32) -> (i32, i32) {
    %c0_i32 = arith.constant 0 : i32
    %c0_i32_0 = arith.constant 0 : i32
    return %arg0, %c0_i32 : i32, i32
  }
  func.func @transform_1(%arg0: i32) -> (i32, i32) {
    %c0_i32 = arith.constant 0 : i32
    %c0_i32_0 = arith.constant 0 : i32
    return %arg0, %c0_i32 : i32, i32
  }
  func.func @transform_2(%arg0: i32) -> (i32, i32, i32) {
    %c0_i32 = arith.constant 0 : i32
    %c0_i32_0 = arith.constant 0 : i32
    %c0_i32_1 = arith.constant 0 : i32
    return %arg0, %c0_i32, %c0_i32_0 : i32, i32, i32
  }
}

</mosaic_0001>

<bundles_post_ra>
// kernel: tpu_custom_call.1
= control target key start
LH: loop header
LB: loop body
LE: loop exit
PB: predicated region body
PF: predicated region fallthrough
CT: control target
= control target key end

     0   :  { %7 = vsyncpa [#allocation3], 0  ;;  %s245_s0 = inlined_call_operand.hbm [shape: f32[8,32], index: 0, kind: input, shape index: {}]   ;;  %s246_s1 = inlined_call_operand.hbm [shape: f32[8,32], index: 1, kind: input, shape index: {}]   ;;  %s247_s2 = inlined_call_operand.hbm [shape: f32[1,8,128], index: 2, kind: output, shape index: {}]  }
   0x1   :  { %8 = vsyncpa [#allocation6], 0 }
   0x2   :  { %9 = vsyncpa [#allocation4], 0  ;;  %s186_s9 = smov [#allocation2]   ;;  %s187_s11 = smov [#allocation5]  }
   0x3   :  { %s16_s10 = sshll.u32 %s186_s9, 4  ;;  %s26_s12 = sshll.u32 %s187_s11, 4  ;;  %s17_s10 = int_to_ptr.vmem [resolvable:$true] %s16_s10  ;;  %s27_s12 = int_to_ptr.vmem [resolvable:$true] %s26_s12 }
   0x4   :  { %s114_s15 = scalar_lea.hbm %s245_s0, 128 }
   0x5   :  { %p115_p0 = scmp.ne.s32.totalorder %s245_s0, %s114_s15  ;;  %p118_p1 = scmp.lt.u32.totalorder %s114_s15, %s245_s0 }
   0x7   :  { %p120_p2 = pnand %p118_p1, %p115_p0 }
   0x9   :  { %123 = shalt.err (!%p120_p2)
}
   0xa   :  { %s124_s20 = scalar_lea.vmem %s17_s10, 128  ;;  %p129_p4 = scmp.lt.s32.totalorder %s17_s10, %s17_s10 }
   0xb   :  { %p125_p3 = scmp.ne.s32.totalorder %s17_s10, %s124_s20  ;;  %p130_p5 = scmp.lt.s32.totalorder %s124_s20, %s124_s20 }
   0xd   :  { %p131_p6 = por %p130_p5, %p129_p4 }
   0xf   :  { %p132_p7 = pnand %p131_p6, %p125_p3 }
  0x11   :  { %135 = shalt.err (!%p132_p7)
}
  0x12   :  { %19 = dma.hbm_to_vmem [thread:$0]  %s245_s0, 128, %s17_s10, [#allocation3]  }
  0x13   :  { %s136_s25 = scalar_lea.hbm %s246_s1, 128 }
  0x14   :  { %p137_p8 = scmp.ne.s32.totalorder %s246_s1, %s136_s25  ;;  %p140_p9 = scmp.lt.u32.totalorder %s136_s25, %s246_s1 }
  0x16   :  { %p142_p10 = pnand %p140_p9, %p137_p8 }
  0x18   :  { %145 = shalt.err (!%p142_p10)
}
  0x19   :  { %s146_s30 = scalar_lea.vmem %s27_s12, 128  ;;  %p151_p12 = scmp.lt.s32.totalorder %s27_s12, %s27_s12 }
  0x1a   :  { %p147_p11 = scmp.ne.s32.totalorder %s27_s12, %s146_s30  ;;  %p152_p13 = scmp.lt.s32.totalorder %s146_s30, %s146_s30 }
  0x1c   :  { %p153_p0 = por %p152_p13, %p151_p12 }
  0x1e   :  { %p154_p1 = pnand %p153_p0, %p147_p11 }
  0x20   :  { %157 = shalt.err (!%p154_p1)
}
  0x21   :  { %29 = dma.hbm_to_vmem [thread:$0]  %s246_s1, 128, %s27_s12, [#allocation6]  }
  0x22   :  { %180 = dma.done.wait [#allocation3], 128  }
  0x23   :  { %181 = vsyncadd [#allocation3], 4294967168 }
  0x24   :  { %182 = dma.done.wait [#allocation6], 128  }
  0x25   :  { %183 = vsyncadd [#allocation6], 4294967168  ;;  %v36_v0 = vld [vmem:[#allocation2] sm:$0xff]  ;;  %vm40_vm0 = vcmask 261120   ;;  %v38_v1 = vld [vmem:[#allocation5] sm:$0xff]  ;;  %s188_s1 = smov [#allocation7]  }
  0x26   :  { %v37_v2 = vmul.f32 0.5, %v36_v0  ;;  %v39_v3 = vmul.f32 0.5, %v38_v1  ;;  %s89_s4 = sshll.u32 %s188_s1, 4  ;;  %s90_s4 = int_to_ptr.vmem [resolvable:$true] %s89_s4 }
  0x27   :  { %s158_s6 = scalar_lea.vmem %s90_s4, 128  ;;  %p163_p3 = scmp.lt.s32.totalorder %s90_s4, %s90_s4 }
  0x28   :  { %v41_v4 = vsel %vm40_vm0, %v37_v2, -inf  ;;  %v52_v5 = vsel %vm40_vm0, %v39_v3, -inf  ;;  %p159_p2 = scmp.ne.s32.totalorder %s90_s4, %s158_s6  ;;  %p164_p4 = scmp.lt.s32.totalorder %s158_s6, %s158_s6 }
  0x29   :  { %42 = vmax.xlane.f32.xlu0 %v41_v4 }
  0x2a   :  { %p165_p5 = por %p164_p4, %p163_p3 }
  0x2c   :  { %p166_p6 = pnand %p165_p5, %p159_p2 }
  0x2d   :  { %53 = vmax.xlane.f32.xlu0 %v52_v5 }
  0xb6   :  { %v43_v6 = vpop.xlane.xlu0 %42 }
  0xb7   :  { %v44_v7 = vsub.f32 %v37_v2, %v43_v6 }
  0xb9   :  { %v45_v8 = vmul.f32 1.442695, %v44_v7 }
  0xba   :  { %v54_v9 = vpop.xlane.xlu0 %53 }
  0xbb   :  { %104 = vpow2.f32 %v45_v8  ;;  %v55_v10 = vsub.f32 %v39_v3, %v54_v9 }
  0xbd   :  { %v56_v11 = vmul.f32 1.442695, %v55_v10 }
  0xbf   :  { %106 = vpow2.f32 %v56_v11 }
  0xc5   :  { %v105_v12 = vpop.eup %104 }
  0xc6   :  { %v47_v13 = vsel %vm40_vm0, %v105_v12, 0.0 }
  0xc7   :  { %48 = vadd.xlane.f32.xlu1 %v47_v13 }
  0xc9   :  { %v107_v14 = vpop.eup %106 }
  0xca   :  { %v58_v15 = vsel %vm40_vm0, %v107_v14, 0.0 }
  0xcb   :  { %59 = vadd.xlane.f32.xlu1 %v58_v15 }
 0x154   :  { %v49_v16 = vpop.xlane.xlu1 %48 }
 0x155   :  { %108 = vrcp.f32 %v49_v16 }
 0x158   :  { %v60_v17 = vpop.xlane.xlu1 %59 }
 0x159   :  { %110 = vrcp.f32 %v60_v17 }
 0x15f   :  { %v109_v18 = vpop.eup %108 }
 0x160   :  { %v51_v20 = vmul.f32 %v109_v18, %v105_v12 }
 0x163   :  { %v111_v19 = vpop.eup %110 }
 0x164   :  { %v62_v21 = vmul.f32 %v111_v19, %v107_v14 }
 0x166   :  { %v63_v22 = vadd.f32 %v62_v21, %v51_v20 }
 0x168   :  { %v64_v23 = vmul.f32 0.5, %v63_v22 }
 0x16a   :  { %112 = vlog2.f32 %v64_v23  ;;  %vm65_vm1 = vcmp.gt.f32.partialorder %v64_v23, 0.0 }
 0x174   :  { %v113_v24 = vpop.eup %112 }
 0x175   :  { %v67_v25 = vmul.f32 0.6931472, %v113_v24 }
 0x177   :  { %v68_v26 = vsub.f32 %v67_v25, %v64_v23 }
 0x179   :  { %v69_v27 = vmul.f32 %v68_v26, %v64_v23 }
 0x17b   :  { %v70_v28 = vsel %vm65_vm1, %v69_v27, 0.0 }
 0x17c   :  { %v71_v29 = vsel %vm40_vm0, %v70_v28, 0.0 }
 0x17d   :  { %72 = vadd.xlane.f32.xlu0 %v71_v29 }
 0x20a   :  { %v73_v30 = vpop.xlane.xlu0 %72 }
 0x20b   :  { %v74_v31 = vrot.slane %v73_v30, 4 }
 0x20d   :  { %v75_v32 = vadd.f32 %v74_v31, %v73_v30 }
 0x20f   :  { %v76_v33 = vrot.slane %v75_v32, 2 }
 0x211   :  { %v77_v34 = vadd.f32 %v76_v33, %v75_v32 }
 0x213   :  { %v78_v35 = vrot.slane %v77_v34, 1 }
 0x215   :  { %v79_v36 = vadd.f32 %v78_v35, %v77_v34 }
 0x217   :  { %99 = vpush %v79_v36 }
 0x248   :  { %s100_s5 = spop %99 }
 0x249   :  { %v81_v37 = vstv %s100_s5 }
 0x24a   :  { %82 = vst [vmem:[#allocation7] sm:$0xff] %v81_v37 }
 0x24b   :  { %169 = shalt.err (!%p166_p6)
}
 0x24c   :  { %s170_s9 = scalar_lea.hbm %s247_s2, 128 }
 0x24d   :  { %p171_p7 = scmp.ne.s32.totalorder %s247_s2, %s170_s9  ;;  %p174_p8 = scmp.lt.u32.totalorder %s170_s9, %s247_s2 }
 0x24f   :  { %p176_p9 = pnand %p174_p8, %p171_p7 }
 0x251   :  { %179 = shalt.err (!%p176_p9)
}
 0x252   :  { %92 = dma.vmem_to_hbm [thread:$0]  %s90_s4, 128, %s247_s2, [#allocation4]  }
 0x253   :  { %184 = dma.done.wait [#allocation4], 128  }
 0x254   :  { %185 = vsyncadd [#allocation4], 4294967168 }
 0x255   :  { %96 = vsyncpa [#allocation3], 1 }
 0x256   :  { %97 = vsyncpa [#allocation6], 1 }
 0x257   :  { %98 = vsyncpa [#allocation4], 1 }

</bundles_post_ra>
